<compile_context>
chip_gen: v7x
topology: tpu7x:2x2x1
jax: 0.10.0
libtpu: 0.0.40
codegen_flags: <defaults>
</compile_context>

<pallas_src>
import functools
import math

import jax
import jax.numpy as jnp
import numpy as np
from jax.experimental import pallas as pl
from jax.experimental.pallas import tpu as pltpu


def _basic_block_kernel(x_ref, w1_ref, b1_ref, w2_ref, b2_ref, o_ref, mid_ref,
                        *, H, W, Wp):
    """One batch image per grid step.

    x_ref  : (Cp,  XLEN) bf16   flattened zero-padded image, XLEN = (H+3)*Wp
    w1_ref : (Cp, 9*Cp)  bf16   BN1 scale folded in, col = (dy*3+dx)*Cp + cin
    b1_ref : (Cp, 1)     f32
    w2_ref : (Cp, 9*Cp)  bf16   BN2 scale folded in
    b2_ref : (Cp, 1)     f32
    o_ref  : (Cp, L)     f32    L = H*Wp; lanes with (j % Wp) >= W are junk
    mid_ref: (Cp, XLEN)  bf16   persistent VMEM scratch: conv2's zero-padded input
    """
    L = H * Wp

    # Lane-validity mask for the padded-width layout (junk lanes: x >= W).
    lane = jax.lax.broadcasted_iota(jnp.int32, (1, L), 1)
    valid = (lane % Wp) < W                                  # (1, L) bool

    def im2col(ref):
        # Every 3x3 tap is a contiguous lane slice of the flattened padded image.
        # Static slices of a *Ref* lower to plain vector loads (no register-slice
        # rotates / hidden VMEM copies) and are already bf16, so the (9*Cp, L)
        # im2col intermediate never exists in f32.  Each piece is 16k rows (bf16
        # sublane tile) so the sublane concat is fully aligned.
        taps = [ref[:, dy * Wp + dx: dy * Wp + dx + L]
                for dy in range(3) for dx in range(3)]
        return jnp.concatenate(taps, axis=0)                 # (9*Cp, L) bf16

    # ---- conv1 (+ folded BN1): one (Cp, 9Cp) @ (9Cp, L) bf16 MXU matmul, f32 acc.
    acc1 = jnp.dot(w1_ref[...], im2col(x_ref),
                   preferred_element_type=jnp.float32)       # (Cp, L) f32

    # bias + ReLU in f32; zero the junk lanes so they serve as conv2's zero padding.
    h1 = jnp.where(valid, jnp.maximum(acc1 + b1_ref[...], 0.0), 0.0)

    # ---- re-pad h1 through the persistent bf16 VMEM scratch (no register concat).
    # Re-zeroing the whole scratch each step is a tiny bf16 store and keeps every
    # grid step self-contained (safe when the batch axis is sharded across cores).
    # TODO(synk): at real ResNet sizes zero only the pad strips once per core.
    mid_ref[...] = jnp.zeros_like(mid_ref)
    mid_ref[:, Wp + 1: Wp + 1 + L] = h1.astype(mid_ref.dtype)

    # ---- conv2 (+ folded BN2), taps sliced straight from the scratch ref.
    acc2 = jnp.dot(w2_ref[...], im2col(mid_ref),
                   preferred_element_type=jnp.float32)       # (Cp, L) f32

    # ---- bias + identity residual (upcast to f32) + ReLU; lane-dense f32 store.
    residual = x_ref[:, Wp + 1: Wp + 1 + L].astype(jnp.float32)
    o_ref[...] = jnp.maximum(acc2 + b2_ref[...] + residual, 0.0).astype(o_ref.dtype)


def basic_block_pallas(x_nchw, w1_oihw, bn1_params, w2_oihw, bn2_params, eps=1e-5):
    """PyTorch-convention inputs (NCHW / OIHW), eval-mode BN; returns NCHW f32."""
    g1, be1, m1, v1 = bn1_params
    g2, be2, m2, v2 = bn2_params
    scale1 = g1 / jnp.sqrt(v1 + eps)
    bias1 = (be1 - m1 * scale1).astype(jnp.float32)
    scale2 = g2 / jnp.sqrt(v2 + eps)
    bias2 = (be2 - m2 * scale2).astype(jnp.float32)

    N, Cin, H, W = x_nchw.shape
    Cout = w1_oihw.shape[0]
    assert Cin == Cout, "identity residual requires inplanes == planes"

    # Pad channels to a multiple of 16 so every bf16 im2col piece is sublane-tile
    # aligned (no-op for real ResNet channel counts, which are multiples of 16).
    Cp = -(-Cin // 16) * 16

    # Padded row width: at least W+2 (conv halo), rounded up so L = H*Wp is a
    # multiple of 128 -> unmasked lane-dense output stores and full MXU N-tiles.
    g = 128 // math.gcd(H, 128)
    Wp = -((W + 2) // -g) * g
    if Wp > 2 * (W + 2):          # avoid pathological padding for awkward H
        Wp = W + 2
    L = H * Wp                    # lane width of the conv outputs
    XLEN = (H + 3) * Wp           # 1 top pad row + H rows + 2 bottom slack rows

    # Zero pad (channels -> Cp, top=1, bottom=2, left=1, right=Wp-W-1) in bf16 and
    # flatten spatial dims so each 3x3 tap is a contiguous lane slice at dy*Wp + dx.
    # bf16 input halves the HBM->VMEM DMA; elementwise / residual math stays f32.
    xpad = jnp.pad(x_nchw.astype(jnp.bfloat16),
                   ((0, 0), (0, Cp - Cin), (1, 2), (1, Wp - W - 1)))
    xflat = xpad.reshape(N, Cp, XLEN)

    # Fold BN scale into conv weights; pad both channel dims to Cp; column order =
    # (dy*3+dx)*Cp + cin; bf16 for the MXU.  Padded rows/cols are zero, so padded
    # output channels stay exactly zero and are sliced off below.
    def fold(w, scale):
        wf = (w * scale[:, None, None, None]).transpose(0, 2, 3, 1)   # (O,3,3,I)
        wf = jnp.pad(wf, ((0, Cp - wf.shape[0]), (0, 0), (0, 0), (0, Cp - wf.shape[3])))
        return wf.reshape(Cp, 9 * Cp).astype(jnp.bfloat16)

    w1mat = fold(w1_oihw, scale1)
    w2mat = fold(w2_oihw, scale2)
    b1p = jnp.pad(bias1, (0, Cp - Cout)).reshape(Cp, 1)
    b2p = jnp.pad(bias2, (0, Cp - Cout)).reshape(Cp, 1)

    kernel = functools.partial(_basic_block_kernel, H=H, W=W, Wp=Wp)

    # NOTE(scaling): for real ResNet shapes (e.g. C=64, H=W=56) add an H-row block
    # axis (2-row halo, 8-16 output rows per step) and/or stack several images along
    # the lane axis per step, and budget double-buffered blocks + the (Cp, XLEN)
    # scratch via pltpu.CompilerParams(vmem_limit_bytes=...) against ~48 MiB on v7x
    # (64 MiB physical VMEM) / ~100 MiB on v5e/v6e.  At this toy size one image per
    # grid step fits trivially in the default scoped VMEM.
    out_flat = pl.pallas_call(
        kernel,
        out_shape=jax.ShapeDtypeStruct((N, Cp, L), jnp.float32),
        grid_spec=pltpu.PrefetchScalarGridSpec(
            num_scalar_prefetch=0,
            grid=(N,),
            in_specs=[
                pl.BlockSpec((None, Cp, XLEN), lambda b: (b, 0, 0)),
                pl.BlockSpec((Cp, 9 * Cp), lambda b: (0, 0)),
                pl.BlockSpec((Cp, 1), lambda b: (0, 0)),
                pl.BlockSpec((Cp, 9 * Cp), lambda b: (0, 0)),
                pl.BlockSpec((Cp, 1), lambda b: (0, 0)),
            ],
            out_specs=pl.BlockSpec((None, Cp, L), lambda b: (b, 0, 0)),
            scratch_shapes=[pltpu.VMEM((Cp, XLEN), jnp.bfloat16)],
        ),
        compiler_params=pltpu.CompilerParams(dimension_semantics=("parallel",)),
    )(xflat, w1mat, b1p, w2mat, b2p)

    # Drop padded channels and the Wp-W junk lanes per row; result is NCHW.
    return out_flat.reshape(N, Cp, H, Wp)[:, :Cout, :, :W]


def basic_block_ref(x_nchw, w1_oihw, bn1_params, w2_oihw, bn2_params, eps=1e-5):
    """Pure-JAX f32 reference (NCHW, matches PyTorch eval-mode semantics)."""
    def conv(x, w):
        return jax.lax.conv_general_dilated(
            x, w, window_strides=(1, 1), padding="SAME",
            dimension_numbers=("NCHW", "OIHW", "NCHW"))

    def bn(x, p):
        g, b, m, v = p
        bc = lambda a: a[None, :, None, None]
        return (x - bc(m)) / jnp.sqrt(bc(v) + eps) * bc(g) + bc(b)

    out = jax.nn.relu(bn(conv(x_nchw, w1_oihw), bn1_params))
    out = bn(conv(out, w2_oihw), bn2_params)
    return jax.nn.relu(out + x_nchw)


if __name__ == "__main__":
    N, C, H, W = 2, 8, 16, 16   # inplanes = planes = 8, stride = 1, downsample = None
    key = jax.random.PRNGKey(0)
    ks = jax.random.split(key, 10)

    x = jax.random.normal(ks[0], (N, C, H, W), jnp.float32)
    w1 = jax.random.normal(ks[1], (C, C, 3, 3), jnp.float32) * 0.1
    w2 = jax.random.normal(ks[2], (C, C, 3, 3), jnp.float32) * 0.1
    bn1 = (1.0 + 0.1 * jax.random.normal(ks[3], (C,), jnp.float32),   # gamma
           0.1 * jax.random.normal(ks[4], (C,), jnp.float32),          # beta
           0.1 * jax.random.normal(ks[5], (C,), jnp.float32),          # running_mean
           1.0 + 0.1 * jax.random.uniform(ks[6], (C,), jnp.float32))   # running_var
    bn2 = (1.0 + 0.1 * jax.random.normal(ks[7], (C,), jnp.float32),
           0.1 * jax.random.normal(ks[8], (C,), jnp.float32),
           0.1 * jax.random.normal(ks[9], (C,), jnp.float32),
           1.0 + 0.05 * jnp.ones((C,), jnp.float32))

    out = basic_block_pallas(x, w1, bn1, w2, bn2)
    out = jax.block_until_ready(out)

    ref = jax.block_until_ready(basic_block_ref(x, w1, bn1, w2, bn2))
    # bf16 matmul operands + bf16 activation slab (f32 accumulation, f32
    # elementwise/residual math) vs the pure-f32 reference -> loose tolerance.
    np.testing.assert_allclose(np.asarray(out), np.asarray(ref), rtol=5e-2, atol=5e-2)

    print("KERNEL_OK")
</pallas_src>

<mosaic_0001>
module attributes {stable_mosaic.version = 11 : i64} {
  func.func @_basic_block_kernel(%arg0: i32, %arg1: memref<1x16x456xbf16, #tpu.memory_space<vmem>>, %arg2: memref<16x144xbf16, #tpu.memory_space<vmem>>, %arg3: memref<16x1xf32, #tpu.memory_space<vmem>>, %arg4: memref<16x144xbf16, #tpu.memory_space<vmem>>, %arg5: memref<16x1xf32, #tpu.memory_space<vmem>>, %arg6: memref<1x16x384xf32, #tpu.memory_space<vmem>>, %arg7: memref<16x456xbf16, #tpu.memory_space<vmem>>) attributes {dimension_semantics = [#tpu.dimension_semantics<parallel>], iteration_bounds = array<i64: 2>, scalar_prefetch = 0 : i64, scratch_operands = 1 : i64, tpu.core_type = #tpu.core_type<tc>, window_params = [{transform_indices = @transform_0, window_bounds = array<i64: 1, 16, 456>}, {pipeline_mode = #tpu.pipeline_mode<synchronous>, transform_indices = @transform_1, window_bounds = array<i64: 16, 144>}, {pipeline_mode = #tpu.pipeline_mode<synchronous>, transform_indices = @transform_2, window_bounds = array<i64: 16, 1>}, {pipeline_mode = #tpu.pipeline_mode<synchronous>, transform_indices = @transform_3, window_bounds = array<i64: 16, 144>}, {pipeline_mode = #tpu.pipeline_mode<synchronous>, transform_indices = @transform_4, window_bounds = array<i64: 16, 1>}, {transform_indices = @transform_5, window_bounds = array<i64: 1, 16, 384>}]} {
    %0 = tpu.iota {dimensions = array<i32: 1>} : vector<1x384xi32>
    %c24_i32 = arith.constant 24 : i32
    %c0_i32 = arith.constant 0 : i32
    %1 = arith.cmpi eq, %c24_i32, %c0_i32 : i32
    %c1_i32 = arith.constant 1 : i32
    %2 = arith.select %1, %c1_i32, %c24_i32 : i32
    %3 = vector.broadcast %2 : i32 to vector<1x384xi32>
    %4 = arith.remsi %0, %3 : vector<1x384xi32>
    %c0_i32_0 = arith.constant 0 : i32
    %5 = vector.broadcast %c0_i32_0 : i32 to vector<1x384xi32>
    %6 = arith.cmpi ne, %4, %5 : vector<1x384xi32>
    %c0_i32_1 = arith.constant 0 : i32
    %7 = vector.broadcast %c0_i32_1 : i32 to vector<1x384xi32>
    %8 = arith.cmpi slt, %4, %7 : vector<1x384xi32>
    %c0_i32_2 = arith.constant 0 : i32
    %9 = arith.cmpi slt, %2, %c0_i32_2 : i32
    %10 = vector.broadcast %9 : i1 to vector<1x384xi1>
    %11 = vector.broadcast %10 : vector<1x384xi1> to vector<1x384xi1>
    %12 = arith.xori %8, %11 : vector<1x384xi1>
    %13 = arith.andi %12, %6 : vector<1x384xi1>
    %14 = vector.broadcast %2 : i32 to vector<1x384xi32>
    %15 = arith.addi %4, %14 : vector<1x384xi32>
    %16 = arith.select %13, %15, %4 : vector<1x384xi1>, vector<1x384xi32>
    %c16_i32 = arith.constant 16 : i32
    %17 = vector.broadcast %c16_i32 : i32 to vector<1x384xi32>
    %18 = arith.cmpi slt, %16, %17 : vector<1x384xi32>
    %c0 = arith.constant 0 : index
    %c0_3 = arith.constant 0 : index
    %19 = vector.load %arg2[%c0, %c0_3] : memref<16x144xbf16, #tpu.memory_space<vmem>>, vector<16x144xbf16>
    %c0_4 = arith.constant 0 : index
    %c0_5 = arith.constant 0 : index
    %c0_6 = arith.constant 0 : index
    %20 = vector.load %arg1[%c0_4, %c0_5, %c0_6] : memref<1x16x456xbf16, #tpu.memory_space<vmem>>, vector<1x16x384xbf16>
    %21 = vector.shape_cast %20 : vector<1x16x384xbf16> to vector<16x384xbf16>
    %c0_7 = arith.constant 0 : index
    %c0_8 = arith.constant 0 : index
    %c1 = arith.constant 1 : index
    %22 = vector.load %arg1[%c0_7, %c0_8, %c1] : memref<1x16x456xbf16, #tpu.memory_space<vmem>>, vector<1x16x384xbf16>
    %23 = vector.shape_cast %22 : vector<1x16x384xbf16> to vector<16x384xbf16>
    %c0_9 = arith.constant 0 : index
    %c0_10 = arith.constant 0 : index
    %c2 = arith.constant 2 : index
    %24 = vector.load %arg1[%c0_9, %c0_10, %c2] : memref<1x16x456xbf16, #tpu.memory_space<vmem>>, vector<1x16x384xbf16>
    %25 = vector.shape_cast %24 : vector<1x16x384xbf16> to vector<16x384xbf16>
    %c0_11 = arith.constant 0 : index
    %c0_12 = arith.constant 0 : index
    %c24 = arith.constant 24 : index
    %26 = vector.load %arg1[%c0_11, %c0_12, %c24] : memref<1x16x456xbf16, #tpu.memory_space<vmem>>, vector<1x16x384xbf16>
    %27 = vector.shape_cast %26 : vector<1x16x384xbf16> to vector<16x384xbf16>
    %c0_13 = arith.constant 0 : index
    %c0_14 = arith.constant 0 : index
    %c25 = arith.constant 25 : index
    %28 = vector.load %arg1[%c0_13, %c0_14, %c25] : memref<1x16x456xbf16, #tpu.memory_space<vmem>>, vector<1x16x384xbf16>
    %29 = vector.shape_cast %28 : vector<1x16x384xbf16> to vector<16x384xbf16>
    %c0_15 = arith.constant 0 : index
    %c0_16 = arith.constant 0 : index
    %c26 = arith.constant 26 : index
    %30 = vector.load %arg1[%c0_15, %c0_16, %c26] : memref<1x16x456xbf16, #tpu.memory_space<vmem>>, vector<1x16x384xbf16>
    %31 = vector.shape_cast %30 : vector<1x16x384xbf16> to vector<16x384xbf16>
    %c0_17 = arith.constant 0 : index
    %c0_18 = arith.constant 0 : index
    %c48 = arith.constant 48 : index
    %32 = vector.load %arg1[%c0_17, %c0_18, %c48] : memref<1x16x456xbf16, #tpu.memory_space<vmem>>, vector<1x16x384xbf16>
    %33 = vector.shape_cast %32 : vector<1x16x384xbf16> to vector<16x384xbf16>
    %c0_19 = arith.constant 0 : index
    %c0_20 = arith.constant 0 : index
    %c49 = arith.constant 49 : index
    %34 = vector.load %arg1[%c0_19, %c0_20, %c49] : memref<1x16x456xbf16, #tpu.memory_space<vmem>>, vector<1x16x384xbf16>
    %35 = vector.shape_cast %34 : vector<1x16x384xbf16> to vector<16x384xbf16>
    %c0_21 = arith.constant 0 : index
    %c0_22 = arith.constant 0 : index
    %c50 = arith.constant 50 : index
    %36 = vector.load %arg1[%c0_21, %c0_22, %c50] : memref<1x16x456xbf16, #tpu.memory_space<vmem>>, vector<1x16x384xbf16>
    %37 = vector.shape_cast %36 : vector<1x16x384xbf16> to vector<16x384xbf16>
    %38 = tpu.concatenate %21, %23, %25, %27, %29, %31, %33, %35, %37 in 0 : vector<16x384xbf16>, vector<16x384xbf16>, vector<16x384xbf16>, vector<16x384xbf16>, vector<16x384xbf16>, vector<16x384xbf16>, vector<16x384xbf16>, vector<16x384xbf16>, vector<16x384xbf16> -> vector<144x384xbf16>
    %cst = arith.constant dense<0.000000e+00> : vector<16x384xf32>
    %39 = tpu.matmul %19, %38, %cst {dimension_numbers = #tpu.dot_dimension_numbers<[1], [0], [0], [1], [0, 0, 1, 1], [], []>} : vector<16x144xbf16>, vector<144x384xbf16>, vector<16x384xf32> -> vector<16x384xf32>
    %c0_23 = arith.constant 0 : index
    %c0_24 = arith.constant 0 : index
    %40 = vector.load %arg3[%c0_23, %c0_24] : memref<16x1xf32, #tpu.memory_space<vmem>>, vector<16x1xf32>
    %41 = vector.broadcast %40 : vector<16x1xf32> to vector<16x384xf32>
    %42 = arith.addf %39, %41 : vector<16x384xf32>
    %cst_25 = arith.constant 0.000000e+00 : f32
    %43 = vector.broadcast %cst_25 : f32 to vector<16x384xf32>
    %44 = arith.maximumf %42, %43 : vector<16x384xf32>
    %cst_26 = arith.constant 0.000000e+00 : f32
    %45 = vector.shape_cast %18 : vector<1x384xi1> to vector<1x384xi1>
    %46 = vector.broadcast %45 : vector<1x384xi1> to vector<16x384xi1>
    %47 = vector.broadcast %cst_26 : f32 to vector<16x384xf32>
    %48 = arith.select %46, %44, %47 : vector<16x384xi1>, vector<16x384xf32>
    %cst_27 = arith.constant 0.000000e+00 : bf16
    %49 = vector.broadcast %cst_27 : bf16 to vector<16x456xbf16>
    %c0_28 = arith.constant 0 : index
    %c0_29 = arith.constant 0 : index
    %50 = vector.load %arg7[%c0_28, %c0_29] : memref<16x456xbf16, #tpu.memory_space<vmem>>, vector<16x456xbf16>
    tpu.vector_store %arg7[%c0_28, %c0_29], %49 {strides = array<i32>} : memref<16x456xbf16, #tpu.memory_space<vmem>>, vector<16x456xbf16>,
    %51 = arith.truncf %48 : vector<16x384xf32> to vector<16x384xbf16>
    %c0_30 = arith.constant 0 : index
    %c25_31 = arith.constant 25 : index
    %52 = vector.load %arg7[%c0_30, %c25_31] : memref<16x456xbf16, #tpu.memory_space<vmem>>, vector<16x384xbf16>
    tpu.vector_store %arg7[%c0_30, %c25_31], %51 {strides = array<i32>} : memref<16x456xbf16, #tpu.memory_space<vmem>>, vector<16x384xbf16>,
    %c0_32 = arith.constant 0 : index
    %c0_33 = arith.constant 0 : index
    %53 = vector.load %arg4[%c0_32, %c0_33] : memref<16x144xbf16, #tpu.memory_space<vmem>>, vector<16x144xbf16>
    %c0_34 = arith.constant 0 : index
    %c0_35 = arith.constant 0 : index
    %54 = vector.load %arg7[%c0_34, %c0_35] : memref<16x456xbf16, #tpu.memory_space<vmem>>, vector<16x384xbf16>
    %c0_36 = arith.constant 0 : index
    %c1_37 = arith.constant 1 : index
    %55 = vector.load %arg7[%c0_36, %c1_37] : memref<16x456xbf16, #tpu.memory_space<vmem>>, vector<16x384xbf16>
    %c0_38 = arith.constant 0 : index
    %c2_39 = arith.constant 2 : index
    %56 = vector.load %arg7[%c0_38, %c2_39] : memref<16x456xbf16, #tpu.memory_space<vmem>>, vector<16x384xbf16>
    %c0_40 = arith.constant 0 : index
    %c24_41 = arith.constant 24 : index
    %57 = vector.load %arg7[%c0_40, %c24_41] : memref<16x456xbf16, #tpu.memory_space<vmem>>, vector<16x384xbf16>
    %c0_42 = arith.constant 0 : index
    %c25_43 = arith.constant 25 : index
    %58 = vector.load %arg7[%c0_42, %c25_43] : memref<16x456xbf16, #tpu.memory_space<vmem>>, vector<16x384xbf16>
    %c0_44 = arith.constant 0 : index
    %c26_45 = arith.constant 26 : index
    %59 = vector.load %arg7[%c0_44, %c26_45] : memref<16x456xbf16, #tpu.memory_space<vmem>>, vector<16x384xbf16>
    %c0_46 = arith.constant 0 : index
    %c48_47 = arith.constant 48 : index
    %60 = vector.load %arg7[%c0_46, %c48_47] : memref<16x456xbf16, #tpu.memory_space<vmem>>, vector<16x384xbf16>
    %c0_48 = arith.constant 0 : index
    %c49_49 = arith.constant 49 : index
    %61 = vector.load %arg7[%c0_48, %c49_49] : memref<16x456xbf16, #tpu.memory_space<vmem>>, vector<16x384xbf16>
    %c0_50 = arith.constant 0 : index
    %c50_51 = arith.constant 50 : index
    %62 = vector.load %arg7[%c0_50, %c50_51] : memref<16x456xbf16, #tpu.memory_space<vmem>>, vector<16x384xbf16>
    %63 = tpu.concatenate %54, %55, %56, %57, %58, %59, %60, %61, %62 in 0 : vector<16x384xbf16>, vector<16x384xbf16>, vector<16x384xbf16>, vector<16x384xbf16>, vector<16x384xbf16>, vector<16x384xbf16>, vector<16x384xbf16>, vector<16x384xbf16>, vector<16x384xbf16> -> vector<144x384xbf16>
    %cst_52 = arith.constant dense<0.000000e+00> : vector<16x384xf32>
    %64 = tpu.matmul %53, %63, %cst_52 {dimension_numbers = #tpu.dot_dimension_numbers<[1], [0], [0], [1], [0, 0, 1, 1], [], []>} : vector<16x144xbf16>, vector<144x384xbf16>, vector<16x384xf32> -> vector<16x384xf32>
    %c0_53 = arith.constant 0 : index
    %c0_54 = arith.constant 0 : index
    %c25_55 = arith.constant 25 : index
    %65 = vector.load %arg1[%c0_53, %c0_54, %c25_55] : memref<1x16x456xbf16, #tpu.memory_space<vmem>>, vector<1x16x384xbf16>
    %66 = vector.shape_cast %65 : vector<1x16x384xbf16> to vector<16x384xbf16>
    %67 = arith.extf %66 : vector<16x384xbf16> to vector<16x384xf32>
    %c0_56 = arith.constant 0 : index
    %c0_57 = arith.constant 0 : index
    %68 = vector.load %arg5[%c0_56, %c0_57] : memref<16x1xf32, #tpu.memory_space<vmem>>, vector<16x1xf32>
    %69 = vector.broadcast %68 : vector<16x1xf32> to vector<16x384xf32>
    %70 = arith.addf %64, %69 : vector<16x384xf32>
    %71 = arith.addf %70, %67 : vector<16x384xf32>
    %cst_58 = arith.constant 0.000000e+00 : f32
    %72 = vector.broadcast %cst_58 : f32 to vector<16x384xf32>
    %73 = arith.maximumf %71, %72 : vector<16x384xf32>
    %c0_59 = arith.constant 0 : index
    %c0_60 = arith.constant 0 : index
    %c0_61 = arith.constant 0 : index
    %74 = vector.load %arg6[%c0_59, %c0_60, %c0_61] : memref<1x16x384xf32, #tpu.memory_space<vmem>>, vector<1x16x384xf32>
    %75 = vector.shape_cast %74 : vector<1x16x384xf32> to vector<16x384xf32>
    %76 = vector.shape_cast %73 : vector<16x384xf32> to vector<1x16x384xf32>
    tpu.vector_store %arg6[%c0_59, %c0_60, %c0_61], %76 {strides = array<i32>} : memref<1x16x384xf32, #tpu.memory_space<vmem>>, vector<1x16x384xf32>,
    return
  }
  func.func @transform_0(%arg0: i32) -> (i32, i32, i32) {
    %c0_i32 = arith.constant 0 : i32
    %c0_i32_0 = arith.constant 0 : i32
    %c0_i32_1 = arith.constant 0 : i32
    return %arg0, %c0_i32, %c0_i32_0 : i32, i32, i32
  }
  func.func @transform_1(%arg0: i32) -> (i32, i32) {
    %c0_i32 = arith.constant 0 : i32
    %c0_i32_0 = arith.constant 0 : i32
    %c0_i32_1 = arith.constant 0 : i32
    return %c0_i32, %c0_i32_0 : i32, i32
  }
  func.func @transform_2(%arg0: i32) -> (i32, i32) {
    %c0_i32 = arith.constant 0 : i32
    %c0_i32_0 = arith.constant 0 : i32
    %c0_i32_1 = arith.constant 0 : i32
    return %c0_i32, %c0_i32_0 : i32, i32
  }
  func.func @transform_3(%arg0: i32) -> (i32, i32) {
    %c0_i32 = arith.constant 0 : i32
    %c0_i32_0 = arith.constant 0 : i32
    %c0_i32_1 = arith.constant 0 : i32
    return %c0_i32, %c0_i32_0 : i32, i32
  }
  func.func @transform_4(%arg0: i32) -> (i32, i32) {
    %c0_i32 = arith.constant 0 : i32
    %c0_i32_0 = arith.constant 0 : i32
    %c0_i32_1 = arith.constant 0 : i32
    return %c0_i32, %c0_i32_0 : i32, i32
  }
  func.func @transform_5(%arg0: i32) -> (i32, i32, i32) {
    %c0_i32 = arith.constant 0 : i32
    %c0_i32_0 = arith.constant 0 : i32
    %c0_i32_1 = arith.constant 0 : i32
    return %arg0, %c0_i32, %c0_i32_0 : i32, i32, i32
  }
}

</mosaic_0001>

<bundles_post_ra>
// kernel: tpu_custom_call.1
= control target key start
LH: loop header
LB: loop body
LE: loop exit
PB: predicated region body
PF: predicated region fallthrough
CT: control target
= control target key end

     0   :  { %10 = vsyncpa [#allocation4], 0  ;;  %s1662_s0 = inlined_call_operand.hbm [shape: bf16[2,16,456], index: 0, kind: input, shape index: {}]   ;;  %s1663_s1 = inlined_call_operand.vmem [shape: bf16[16,144], index: 1, kind: input, shape index: {}]   ;;  %s1664_s2 = inlined_call_operand.vmem [shape: f32[16,1], index: 2, kind: input, shape index: {}]   ;;  %s1665_s3 = inlined_call_operand.vmem [shape: bf16[16,144], index: 3, kind: input, shape index: {}]   ;;  %s1666_s4 = inlined_call_operand.vmem [shape: f32[16,1], index: 4, kind: input, shape index: {}]   ;;  %s1667_s5 = inlined_call_operand.hbm [shape: f32[2,16,384], index: 5, kind: output, shape index: {}]  }
   0x1   :  { %12 = vsyncpa [#allocation4 + $0x1], 0 }
   0x2   :  { %13 = vsyncpa [#allocation5], 0 }
   0x3   :  { %15 = vsyncpa [#allocation5 + $0x1], 0  ;;  %s1262_s18 = smov 0   ;;  %s1264_s19 = smov 0  }
   0x4   :  { %s1266_s20 = smov 0   ;;  %s1268_s21 = smov 0  }
   0x5 LB: > { %s1283_s22 = sadd.s32 4294967295, %s1214_s21   ;;  %s992_s23 = sadd.s32 4294967294, %s1214_s21   ;;  %s1214_s21 = sphi %s1268_s21, %s1696_s21   ;;  %s1210_s20 = sphi %s1266_s20, %s1695_s20   ;;  %s1206_s19 = sphi %s1264_s19, %s1694_s19   ;;  %s1202_s18 = sphi %s1262_s18, %s1693_s18  }
   0x6   : > { %s1287_s24 = sadd.s32 1, %s1214_s21   ;;  %s28_s25 = sadd.s32 1, %s1210_s20 }
   0x7   : > { %s25_s26 = ssub.s32 %s1214_s21, %s1287_s24  ;;  %p35_p0 = scmp.ne.s32.totalorder %s1210_s20, %s1206_s19 }
   0x8   : > { %p26_p1 = scmp.eq.s32.totalorder %s25_s26, 0  ;;  %p36_p2 = scmp.eq.s32.totalorder %s1214_s21, 0 }
   0x9   : > { %p41_p3 = scmp.ne.s32.totalorder %s1206_s19, %s1202_s18  ;;  %p42_p4 = scmp.eq.s32.totalorder %s1283_s22, 0 }
   0xa   : > { %s1299_s27 = scalar_select %p26_p1, %s1210_s20, %s28_s25  }
   0xb   : > { %p1301_p5 = por %p36_p2, %p35_p0  ;;  %p1305_p6 = por %p42_p4, %p41_p3 }
   0xc   : > { %p149_p7 = scmp.eq.s32.totalorder %s1283_s22, 1  ;;  %p155_p8 = scmp.eq.s32.totalorder %s992_s23, 1 }
   0xd   : > { %p1037_p10 = scmp.lt.s32.totalorder %s1214_s21, 2  ;;  %s187_s7 = sand.u32 1, %s1210_s20  }
   0xe   : > { %p1312_p11 = por %p149_p7, %p35_p0  ;;  %p1316_p12 = por %p155_p8, %p41_p3 }
   0xf   : > { %s1016_s8 = sshll.u32 %s1214_s21, 9  ;;  %s995_s9 = sshll.u32 %s187_s7, 5 }
  0x10   : > { %s1673_s30 = scalar_select %p1312_p11, 1, 0 }
  0x11   : > { %s1674_s6 = scalar_select %p1316_p12, 1, 0 }
  0x12   : > { %s1325_s12 = scalar_lea.hbm %s1662_s0, %s1016_s8  ;;  %s191_s13 = scalar_lea.vmem [#allocation3], %s995_s9 }
  0x13   : > { %s198_s14 = sshll.u32 %s191_s13, 4  ;;  %p1329_p13 = pnand %p1037_p10, %p1301_p5  ;;  %s1333_s14 = int_to_ptr.vmem [resolvable:$true] %s198_s14 }
  0x14   : > { %s1335_s16 = scalar_lea.sflag [#allocation4], %s187_s7  ;;  %s1118_s17 = scalar_lea.hbm %s1325_s12, 512 }
  0x15   : > { %p1119_p0 = scmp.ne.s32.totalorder %s1325_s12, %s1118_s17  ;;  %p1120_p1 = pneg %p1329_p13 }
  0x16   : > { %s1123_s26 = scalar_lea.hbm %s1662_s0, 1024  ;;  %p1124_p4 = scmp.lt.u32.totalorder %s1325_s12, %s1662_s0 }
  0x17   : > { %p1121_p2 = pnand %p1120_p1, %p1119_p0  ;;  %p1125_p5 = scmp.lt.u32.totalorder %s1123_s26, %s1118_s17 }
  0x18   : > { %p1127_p8 = scmp.lt.u32.totalorder %s1118_s17, %s1325_s12 }
  0x19   : > { %p1122_p3 = pneg %p1121_p2  ;;  %p1126_p7 = por %p1125_p5, %p1124_p4 }
  0x1b   : > { %p1128_p10 = por %p1127_p8, %p1126_p7 }
  0x1d   : > { %p1129_p9 = pnand %p1128_p10, %p1122_p3 }
  0x1f   : > { %1132 = shalt.err (!%p1129_p9)
}
  0x20   : > { %s1133_s7 = scalar_lea.vmem %s1333_s14, 512  ;;  %s1216_s9 = smov [#allocation3]  }
  0x21   : > { %p1134_p0 = scmp.ne.s32.totalorder %s1333_s14, %s1133_s7  ;;  %s1138_s10 = sshll.u32 %s1216_s9, 4  ;;  %s1139_s10 = int_to_ptr.vmem [resolvable:$false] %s1138_s10 }
  0x22   : > { %s1140_s11 = scalar_lea.vmem %s1139_s10, 1024  ;;  %p1141_p11 = scmp.lt.s32.totalorder %s1333_s14, %s1139_s10 }
  0x23   : > { %p1136_p2 = pnand %p1134_p0, %p1120_p1  ;;  %p1142_p4 = scmp.lt.s32.totalorder %s1140_s11, %s1133_s7 }
  0x25   : > { %p1137_p12 = pneg %p1136_p2  ;;  %p1143_p5 = por %p1142_p4, %p1141_p11 }
  0x27   : > { %p1144_p7 = pnand %p1143_p5, %p1137_p12 }
  0x29   : > { %1147 = shalt.err (!%p1144_p7)
}
  0x2a   : > { %s1217_s13 = smov 256   ;;  %s1218_s17 = smov 16  }
  0x2b   : > { %1032 = dma.hbm_to_vmem [thread:$0]  (!%p1329_p13), %s1325_s12, 512, %s1333_s14, %s1335_s16, %s1217_s13, %s1217_s13, %s1218_s17  }
  0x2c   : > { %p998_p9 = scmp.ge.s32.totalorder %s1214_s21, 1  ;;  %p206_p1 = scmp.lt.s32.totalorder %s1214_s21, 3 }
  0x2e   : > { %p207_p3 = pnand %p998_p9, %p206_p1 }
  0x2f   : > { %s1366_s23 = sand.u32 (!%p207_p3), 1, %s1206_s19  }
  0x30   : > { %210 = sbr.rel (%p207_p3) target bundleno = 1000 (0x3e8), region = 40  ;;  %s999_s25 = sshll.u32 (!%p207_p3), %s1366_s23, 5 }
  0x31   : > { %s213_s26 = scalar_lea.sflag (!%p207_p3), [#allocation4], %s1366_s23  ;;  %s216_s28 = scalar_lea.vmem (!%p207_p3), [#allocation3], %s999_s25 }
  0x37   : > { %1193 = dma.done.wait (%p1305_p6), %s213_s26, 512  }
  0x38   : > { %1195 = vsyncadd (%p1305_p6), %s213_s26, 4294966784  ;;  %v1219_v0 = vmov 0   ;;  %v1378_v1 = vld [vmem:[%s216_s28] sm:$0xff]  ;;  %v1380_v2 = vld [vmem:[%s216_s28 + $0x10] sm:$0xff]  ;;  %s1220_s29 = smov 127   ;;  %s1221_s12 = smov 126  }
  0x39   : > { %519 = vmatprep.subr.bf16.mxu1 %v1219_v0  ;;  %578 = vst [vmem:[#allocation2] sm:$0xff] %v1219_v0  ;;  %1085 = vset.pattern.permute.xlu0 %v1219_v0  ;;  %v1382_v3 = vld [vmem:[%s216_s28 + $0x8] sm:$0xff]  ;;  %v1001_v4 = vcombine.high %v1378_v1, %v1380_v2  ;;  %v1000_v5 = vcombine.low %v1378_v1, %v1380_v2  ;;  %v1388_v6 = vld [vmem:[%s216_s28 + $0x18] sm:$0xff]  ;;  %s1222_s14 = smov 104   ;;  %s1223_s15 = smov 103   ;;  %vm472_vm0 = vcmask 130048  }
  0x3a   : > { %1086 = vset.pattern.permute.xlu1 %v1219_v0  ;;  %v1111_v7 = vld [vmem:[%s216_s28 + $0x8] ss:$16 sps:$4 sm:$0xff]   ;;  %v1003_v8 = vcombine.low %v1382_v3, %v1388_v6  ;;  %v1004_v9 = vcombine.high %v1382_v3, %v1388_v6  ;;  %s1224_s16 = smov 102   ;;  %s1225_s8 = smov 80   ;;  %v1114_v10 = vld [vmem:[%s1663_s1 + $0x4] ss:$8 sps:$4 sm:$0xff]  }
  0x3b   : > { %333 = vrot.lane.b32.xlu0 %v1001_v4, %s1220_s29  ;;  %331 = vrot.lane.b32.xlu1 %v1000_v5, %s1220_s29  ;;  %s1226_s7 = smov 79   ;;  %s1227_s11 = smov 78   ;;  %v451_v11 = vld [vmem:[%s1664_s2] sm:$0xff]  ;;  %v452_v12 = vld [vmem:[%s1664_s2 + $0x8] sm:$0xff]  ;;  %vm339_vm1 = vcmask 1039360   ;;  %vm354_vm2 = vcmask 1031168  }
  0x3c   : > { %476 = vmatprep.subr.bf16.mxu0 %v1001_v4  ;;  %520 = vmatpush1.bf16.msra.mxu1 %v1111_v7  ;;  %vm369_vm3 = vcmask 850944   ;;  %vm384_vm4 = vcmask 842752   ;;  %vm399_vm5 = vcmask 834560   ;;  %vm414_vm6 = vcmask 654336   ;;  %s1228_s10 = smov 25   ;;  %s1024_s26 = smul.u32 768, %s1283_s22 }
  0x3d   : > { %477 = vmatpush1.bf16.msra.mxu0 %v1000_v5  ;;  %521 = vmatprep.subr.bf16.mxu1 %v1219_v0  ;;  %vm1670_vm7 = vcmask 646144   ;;  %vm1669_vm8 = vcmask 637952   ;;  %p1690_p11 = scmp.ne.s32.totalorder %s1673_s30, 0  ;;  %s1229_s17 = smov [#allocation6]  }
  0x3e   : > { %1007 = vmatprep.mubr.msk.bf16.mxu0 %vm472_vm0, %v1114_v10  ;;  %1008 = vmatprep.mubr.msk.bf16.mxu1 %vm472_vm0, %v1114_v10  ;;  %v1112_v10 = vld [vmem:[%s1663_s1] ss:$8 sps:$4 sm:$0xff]   ;;  %s1618_s9 = scalar_lea.hbm %s1667_s5, %s1024_s26 }
  0x3f   : > { %335 = vrot.lane.b32.xlu0 %v1003_v8, %s1220_s29  ;;  %337 = vrot.lane.b32.xlu1 %v1004_v9, %s1220_s29 }
  0x43   : > { %348 = vrot.lane.b32.xlu0 %v1001_v4, %s1221_s12  ;;  %350 = vrot.lane.b32.xlu1 %v1003_v8, %s1221_s12 }
  0x47   : > { %346 = vrot.lane.b32.xlu0 %v1000_v5, %s1221_s12  ;;  %352 = vrot.lane.b32.xlu1 %v1004_v9, %s1221_s12 }
  0x4b   : > { %363 = vrot.lane.b32.xlu0 %v1001_v4, %s1222_s14  ;;  %365 = vrot.lane.b32.xlu1 %v1003_v8, %s1222_s14 }
  0x4f   : > { %361 = vrot.lane.b32.xlu0 %v1000_v5, %s1222_s14  ;;  %367 = vrot.lane.b32.xlu1 %v1004_v9, %s1222_s14 }
  0x53   : > { %378 = vrot.lane.b32.xlu0 %v1001_v4, %s1223_s15  ;;  %380 = vrot.lane.b32.xlu1 %v1003_v8, %s1223_s15 }
  0x57   : > { %376 = vrot.lane.b32.xlu0 %v1000_v5, %s1223_s15  ;;  %382 = vrot.lane.b32.xlu1 %v1004_v9, %s1223_s15 }
  0x5b   : > { %393 = vrot.lane.b32.xlu0 %v1001_v4, %s1224_s16  ;;  %395 = vrot.lane.b32.xlu1 %v1003_v8, %s1224_s16 }
  0x5f   : > { %391 = vrot.lane.b32.xlu0 %v1000_v5, %s1224_s16  ;;  %397 = vrot.lane.b32.xlu1 %v1004_v9, %s1224_s16 }
  0x63   : > { %408 = vrot.lane.b32.xlu0 %v1001_v4, %s1225_s8  ;;  %410 = vrot.lane.b32.xlu1 %v1003_v8, %s1225_s8 }
  0x67   : > { %406 = vrot.lane.b32.xlu0 %v1000_v5, %s1225_s8  ;;  %412 = vrot.lane.b32.xlu1 %v1004_v9, %s1225_s8 }
  0x6b   : > { %423 = vrot.lane.b32.xlu0 %v1001_v4, %s1226_s7  ;;  %425 = vrot.lane.b32.xlu1 %v1003_v8, %s1226_s7 }
  0x6f   : > { %421 = vrot.lane.b32.xlu0 %v1000_v5, %s1226_s7  ;;  %427 = vrot.lane.b32.xlu1 %v1004_v9, %s1226_s7 }
  0x73   : > { %438 = vrot.lane.b32.xlu0 %v1001_v4, %s1227_s11  ;;  %440 = vrot.lane.b32.xlu1 %v1003_v8, %s1227_s11 }
  0x77   : > { %436 = vrot.lane.b32.xlu0 %v1000_v5, %s1227_s11  ;;  %442 = vrot.lane.b32.xlu1 %v1004_v9, %s1227_s11 }
  0x7b   : > { %455 = vperm.xlu0 %1085, %v451_v11   ;;  %460 = vperm.xlu1 %1086, %v452_v12   ;;  %v244_v11 = vlaneseq }
  0x7d   : > { %v245_v12 = vand.u32 127, %v244_v11 }
  0xad   : > { %v334_v13 = vpop.permute.xlu0 %333  ;;  %v332_v14 = vpop.permute.xlu1 %331 }
  0xae   : > { %v340_v19 = vsel %vm339_vm1, %v332_v14, %v334_v13  ;;  %v246_v14 = vadd.s32 128, %v245_v12 }
  0xb1   : > { %v336_v15 = vpop.permute.xlu0 %335  ;;  %v338_v16 = vpop.permute.xlu1 %337 }
  0xb2   : > { %v341_v17 = vsel %vm339_vm1, %v334_v13, %v336_v15  ;;  %v342_v18 = vsel %vm339_vm1, %v336_v15, %v338_v16  ;;  %v247_v13 = vadd.s32 256, %v245_v12 }
  0xb3   : > { %478 = vmatprep.subr.bf16.mxu0 %v341_v17  ;;  %522 = vmatpush1.bf16.msra.mxu1 %v342_v18  ;;  %v1476_v17 = vmul.u32.u64.low 2863311531, %v245_v12  ;;  %v1477_v18 = vmul.u32.u64.high 2863311531, %v245_v12, %v1476_v17 }
  0xb4   : > { %479 = vmatpush1.bf16.msra.mxu0 %v340_v19  ;;  %523 = vmatprep.subr.bf16.mxu1 %v1219_v0  ;;  %v1473_v15 = vmul.u32.u64.low 2863311531, %v247_v13  ;;  %v1474_v16 = vmul.u32.u64.high 2863311531, %v247_v13, %v1473_v15 }
  0xb5   : > { %v349_v20 = vpop.permute.xlu0 %348  ;;  %v351_v21 = vpop.permute.xlu1 %350 }
  0xb6   : > { %v356_v22 = vsel %vm354_vm2, %v349_v20, %v351_v21 }
  0xb7   : > { %480 = vmatprep.subr.bf16.mxu0 %v356_v22  ;;  %v254_v22 = vshrl.u32 %v1477_v18, 4 }
  0xb9   : > { %v347_v23 = vpop.permute.xlu0 %346  ;;  %v353_v24 = vpop.permute.xlu1 %352 }
  0xba   : > { %v355_v25 = vsel %vm354_vm2, %v347_v23, %v349_v20  ;;  %v357_v26 = vsel %vm354_vm2, %v351_v21, %v353_v24  ;;  %v1479_v19 = vmul.u32.u64.low 2863311531, %v246_v14  ;;  %v1480_v20 = vmul.u32.u64.high 2863311531, %v246_v14, %v1479_v19 }
  0xbb   : > { %481 = vmatpush1.bf16.msra.mxu0 %v355_v25  ;;  %524 = vmatpush1.bf16.msra.mxu1 %v357_v26  ;;  %v276_v21 = vshrl.u32 %v1474_v16, 4  ;;  %v255_v25 = vmul.u32 24, %v254_v22  ;;  %v1115_v19 = vld [vmem:[%s1665_s3 + $0x4] ss:$8 sps:$4 sm:$0xff]   ;;  %v734_v22 = vunpack.c.l.bf16 %v1378_v1 }
  0xbc   : > { %525 = vmatprep.subr.bf16.mxu1 %v1219_v0  ;;  %v265_v23 = vshrl.u32 %v1480_v20, 4  ;;  %v742_v20 = vld [vmem:[%s1666_s4] sm:$0xff] }
  0xbd   : > { %v364_v27 = vpop.permute.xlu0 %363  ;;  %v366_v28 = vpop.permute.xlu1 %365  ;;  %v277_v24 = vmul.u32 24, %v276_v21  ;;  %v743_v21 = vld [vmem:[%s1666_s4 + $0x8] sm:$0xff] }
  0xbe   : > { %v371_v29 = vsel %vm369_vm3, %v364_v27, %v366_v28  ;;  %v266_v26 = vmul.u32 24, %v265_v23  ;;  %v735_v23 = vunpack.c.h.bf16 %v1378_v1 }
  0xbf   : > { %482 = vmatprep.subr.bf16.mxu0 %v371_v29 }
  0xc0   : > { %v267_v29 = vsub.s32 %v246_v14, %v266_v26  ;;  %v738_v26 = vunpack.c.l.bf16 %v1380_v2 }
  0xc1   : > { %v362_v30 = vpop.permute.xlu0 %361  ;;  %v368_v31 = vpop.permute.xlu1 %367 }
  0xc2   : > { %v370_v32 = vsel %vm369_vm3, %v362_v30, %v364_v27  ;;  %v372_v33 = vsel %vm369_vm3, %v366_v28, %v368_v31  ;;  %v278_v27 = vsub.s32 %v247_v13, %v277_v24  ;;  %v256_v28 = vsub.s32 %v245_v12, %v255_v25 }
  0xc3   : > { %483 = vmatpush1.bf16.msra.mxu0 %v370_v32  ;;  %526 = vmatpush1.bf16.msra.mxu1 %v372_v33  ;;  %vm282_vm14 = vcmp.ne.s32.totalorder %v267_v29, 0  ;;  %vm285_vm15 = vcmp.lt.s32.totalorder %v267_v29, 0  ;;  %v736_v24 = vunpack.c.l.bf16 %v1382_v3  ;;  %v737_v25 = vunpack.c.h.bf16 %v1382_v3 }
  0xc4   : > { %527 = vmatprep.subr.bf16.mxu1 %v1219_v0  ;;  %vm283_vm9 = vcmp.ne.s32.totalorder %v278_v27, 0  ;;  %vm286_vm10 = vcmp.lt.s32.totalorder %v278_v27, 0  ;;  %vm281_vm11 = vcmp.ne.s32.totalorder %v256_v28, 0  ;;  %vm284_vm12 = vcmp.lt.s32.totalorder %v256_v28, 0 }
  0xc5   : > { %v379_v34 = vpop.permute.xlu0 %378  ;;  %v381_v35 = vpop.permute.xlu1 %380  ;;  %v292_v30 = vadd.s32 24, %v278_v27  ;;  %vm1485_vm13 = vmand %vm286_vm10, %vm283_vm9  ;;  %v290_v32 = vadd.s32 24, %v256_v28  ;;  %vm581_vm9 = vcmask 588800   ;;  %v1092_v31 = vpack.i.bf16 %v737_v25, %v736_v24  ;;  %v1117_v25 = vld [vmem:[%s1665_s3] ss:$8 sps:$4 sm:$0xff]  }
  0xc6   : > { %v386_v36 = vsel %vm384_vm4, %v379_v34, %v381_v35  ;;  %582 = vst.msk [vmem:[#allocation2 + $0x18] sm:$0xff] %vm581_vm9, %v1219_v0 }
  0xc7   : > { %484 = vmatprep.subr.bf16.mxu0 %v386_v36  ;;  %v295_v36 = vsel %vm1485_vm13, %v292_v30, %v278_v27  ;;  %v739_v27 = vunpack.c.h.bf16 %v1380_v2  ;;  %v1087_v30 = vpack.i.bf16 %v735_v23, %v734_v22 }
  0xc8   : > { %vm1502_vm10 = vcmp.lt.s32.totalorder %v295_v36, 16 }
  0xc9   : > { %v377_v37 = vpop.permute.xlu0 %376  ;;  %v383_v38 = vpop.permute.xlu1 %382 }
  0xca   : > { %v385_v39 = vsel %vm384_vm4, %v377_v37, %v379_v34  ;;  %v387_v40 = vsel %vm384_vm4, %v381_v35, %v383_v38  ;;  %v291_v35 = vadd.s32 24, %v267_v29 }
  0xcb   : > { %485 = vmatpush1.bf16.msra.mxu0 %v385_v39  ;;  %528 = vmatpush1.bf16.msra.mxu1 %v387_v40 }
  0xcc   : > { %529 = vmatprep.subr.bf16.mxu1 %v1219_v0 }
  0xcd   : > { %v394_v41 = vpop.permute.xlu0 %393  ;;  %v396_v42 = vpop.permute.xlu1 %395 }
  0xce   : > { %v401_v43 = vsel %vm399_vm5, %v394_v41, %v396_v42 }
  0xcf   : > { %486 = vmatprep.subr.bf16.mxu0 %v401_v43 }
  0xd1   : > { %v392_v44 = vpop.permute.xlu0 %391  ;;  %v398_v45 = vpop.permute.xlu1 %397 }
  0xd2   : > { %v400_v46 = vsel %vm399_vm5, %v392_v44, %v394_v41  ;;  %v402_v47 = vsel %vm399_vm5, %v396_v42, %v398_v45 }
  0xd3   : > { %487 = vmatpush1.bf16.msra.mxu0 %v400_v46  ;;  %530 = vmatpush1.bf16.msra.mxu1 %v402_v47 }
  0xd4   : > { %531 = vmatprep.subr.bf16.mxu1 %v1219_v0 }
  0xd5   : > { %v409_v48 = vpop.permute.xlu0 %408  ;;  %v411_v49 = vpop.permute.xlu1 %410 }
  0xd6   : > { %v416_v50 = vsel %vm414_vm6, %v409_v48, %v411_v49 }
  0xd7   : > { %488 = vmatprep.subr.bf16.mxu0 %v416_v50 }
  0xd9   : > { %v407_v51 = vpop.permute.xlu0 %406  ;;  %v413_v52 = vpop.permute.xlu1 %412 }
  0xda   : > { %v415_v53 = vsel %vm414_vm6, %v407_v51, %v409_v48  ;;  %v417_v54 = vsel %vm414_vm6, %v411_v49, %v413_v52 }
  0xdb   : > { %489 = vmatpush1.bf16.msra.mxu0 %v415_v53  ;;  %532 = vmatpush1.bf16.msra.mxu1 %v417_v54 }
  0xdc   : > { %533 = vmatprep.subr.bf16.mxu1 %v1219_v0 }
  0xdd   : > { %v424_v55 = vpop.permute.xlu0 %423  ;;  %v426_v56 = vpop.permute.xlu1 %425 }
  0xde   : > { %v431_v57 = vsel %vm1670_vm7, %v424_v55, %v426_v56 }
  0xdf   : > { %490 = vmatprep.subr.bf16.mxu0 %v431_v57 }
  0xe1   : > { %v422_v58 = vpop.permute.xlu0 %421  ;;  %v428_v59 = vpop.permute.xlu1 %427 }
  0xe2   : > { %v430_v60 = vsel %vm1670_vm7, %v422_v58, %v424_v55  ;;  %v432_v61 = vsel %vm1670_vm7, %v426_v56, %v428_v59  ;;  %vm1495_vm7 = vmand %vm285_vm15, %vm282_vm14 }
  0xe3   : > { %491 = vmatpush1.bf16.msra.mxu0 %v430_v60  ;;  %534 = vmatpush1.bf16.msra.mxu1 %v432_v61  ;;  %v294_v47 = vsel %vm1495_vm7, %v291_v35, %v267_v29  ;;  %vm602_vm7 = vcmask 1047752   ;;  %v741_v29 = vunpack.c.h.bf16 %v1388_v6 }
  0xe4   : > { %535 = vmatprep.subr.bf16.mxu1 %v1219_v0 }
  0xe5   : > { %v439_v62 = vpop.permute.xlu0 %438  ;;  %v441_v63 = vpop.permute.xlu1 %440 }
  0xe6   : > { %v446_v4 = vsel %vm1669_vm8, %v439_v62, %v441_v63 }
  0xe7   : > { %492 = vmatprep.subr.bf16.mxu0 %v446_v4 }
  0xe9   : > { %v437_v5 = vpop.permute.xlu0 %436  ;;  %v443_v7 = vpop.permute.xlu1 %442 }
  0xea   : > { %v445_v8 = vsel %vm1669_vm8, %v437_v5, %v439_v62  ;;  %v447_v9 = vsel %vm1669_vm8, %v441_v63, %v443_v7  ;;  %vm1489_vm8 = vmand %vm284_vm12, %vm281_vm11  ;;  %vm297_vm11 = vcmp.lt.s32.totalorder %v294_v47, 16  ;;  %vm595_vm12 = vcmask 203776  }
  0xeb   : > { %493 = vmatpush1.bf16.msra.mxu0 %v445_v8  ;;  %536 = vmatpush1.bf16.msra.mxu1 %v447_v9  ;;  %v293_v41 = vsel %vm1489_vm8, %v290_v32, %v256_v28  ;;  %v740_v28 = vunpack.c.l.bf16 %v1388_v6  ;;  %v1097_v32 = vpack.i.bf16 %v739_v27, %v738_v26 }
  0xec   : > { %809 = vmatprep.subr.bf16.mxu1 %v1219_v0  ;;  %vm296_vm8 = vcmp.lt.s32.totalorder %v293_v41, 16 }
  0xed   : > { %v1102_v1 = vpack.i.bf16 %v741_v29, %v740_v28 }
  0xee   : > { %509 = vmatmul.mubr.bf16.vlgmr.msra.gmra.mrb[0].mxu0 %v1112_v10  ;;  %552 = vmatmul.mubr.bf16.vlgmr.msra.gmra.mrb[0].mxu1 %v1112_v10 }
  0xef   : > { %1011 = vmatprep.mubr.msk.bf16.mxu0 %vm472_vm0, %v1115_v19  ;;  %1012 = vmatprep.mubr.msk.bf16.mxu1 %vm472_vm0, %v1115_v19  ;;  %vm1684_vm0 = vcmask 646144  }
  0xfa   : > { %v456_v33 = vpop.permute.xlu0 %455  ;;  %v461_v38 = vpop.permute.xlu1 %460 }
 0x1c1   : > { %v510_v39 = vpop.f32.mrb[0].mxu0  ;;  %v553_v40 = vpop.f32.mrb[0].mxu1 }
 0x1c2   : > { %v511_v42 = vadd.f32 %v510_v39, %v456_v33  ;;  %v554_v43 = vadd.f32 %v553_v40, %v456_v33  ;;  %v512_v44 = vpop.f32.mrb[1].mxu0  ;;  %v555_v45 = vpop.f32.mrb[1].mxu1 }
 0x1c3   : > { %v513_v48 = vadd.f32 %v512_v44, %v456_v33  ;;  %v514_v49 = vpop.f32.mrb[2].mxu0  ;;  %v556_v50 = vpop.f32.mrb[2].mxu1 }
 0x1c4   : > { %v560_v51 = vmax.f32 %v511_v42, 0.0  ;;  %v562_v52 = vmax.f32 %v554_v43, 0.0  ;;  %v515_v53 = vadd.f32 %v514_v49, %v461_v38  ;;  %v557_v54 = vadd.f32 %v556_v50, %v461_v38  ;;  %v516_v55 = vpop.f32.mrb[3].mxu0  ;;  %v558_v56 = vpop.f32.mrb[3].mxu1 }
 0x1c5   : > { %v561_v57 = vmax.f32 %v513_v48, 0.0  ;;  %v517_v58 = vadd.f32 %v516_v55, %v461_v38 }
 0x1c6   : > { %v574_v59 = vsel %vm1502_vm10, %v562_v52, 0.0  ;;  %v563_v60 = vmax.f32 %v515_v53, 0.0  ;;  %v565_v61 = vmax.f32 %v557_v54, 0.0  ;;  %v572_v63 = vsel %vm296_vm8, %v560_v51, 0.0 }
 0x1c7   : > { %v564_v62 = vmax.f32 %v517_v58, 0.0  ;;  %v573_v7 = vsel %vm297_vm11, %v561_v57, 0.0 }
 0x1c8   : > { %v575_v4 = vsel %vm296_vm8, %v563_v60, 0.0  ;;  %v577_v5 = vsel %vm1502_vm10, %v565_v61, 0.0 }
 0x1c9   : > { %v576_v8 = vsel %vm297_vm11, %v564_v62, 0.0  ;;  %v583_v9 = vpack.c.bf16 %v575_v4, %v572_v63  ;;  %v585_v10 = vpack.c.bf16 %v577_v5, %v574_v59 }
 0x1ca   : > { %v584_v11 = vpack.c.bf16 %v576_v8, %v573_v7 }
 0x1cb   : > { %589 = vrot.lane.b32.xlu1 %v583_v9, %s1228_s10 }
 0x1cc   : > { %591 = vrot.lane.b32.xlu0 %v584_v11, %s1228_s10 }
 0x1cf   : > { %593 = vrot.lane.b32.xlu1 %v585_v10, %s1228_s10  ;;  %s906_s10 = scalar_lea.sflag [#allocation5], %s1366_s23 }
 0x23d   : > { %v590_v12 = vpop.permute.xlu1 %589 }
 0x23e   : > { %603 = vst.msk [vmem:[#allocation2] sm:$0xff] %vm602_vm7, %v590_v12  ;;  %v592_v13 = vpop.permute.xlu0 %591 }
 0x23f   : > { %v596_v14 = vsel %vm595_vm12, %v590_v12, %v592_v13 }
 0x240   : > { %766 = vmatprep.subr.bf16.mxu0 %v596_v14 }
 0x241   : > { %v594_v15 = vpop.permute.xlu1 %593 }
 0x242   : > { %v597_v16 = vsel %vm595_vm12, %v592_v13, %v594_v15  ;;  %607 = vst.msk [vmem:[#allocation2 + $0x18] sm:$0xff] %vm595_vm12, %v594_v15 }
 0x243   : > { %810 = vmatpush1.bf16.msra.mxu1 %v597_v16 }
 0x244   : > { %811 = vmatprep.subr.bf16.mxu1 %v1219_v0 }
 0x245   : > { %v610_v17 = vld [vmem:[#allocation2] sm:$0xff] }
 0x246   : > { %618 = vrot.lane.b32.xlu0 %v610_v17, %s1220_s29  ;;  %767 = vmatpush1.bf16.msra.mxu0 %v610_v17 }
 0x249   : > { %v613_v18 = vld [vmem:[#allocation2 + $0x18] sm:$0xff] }
 0x24a   : > { %632 = vrot.lane.b32.xlu0 %v610_v17, %s1221_s12  ;;  %624 = vrot.lane.b32.xlu1 %v613_v18, %s1220_s29 }
 0x24e   : > { %646 = vrot.lane.b32.xlu0 %v610_v17, %s1222_s14  ;;  %638 = vrot.lane.b32.xlu1 %v613_v18, %s1221_s12 }
 0x252   : > { %660 = vrot.lane.b32.xlu0 %v610_v17, %s1223_s15  ;;  %652 = vrot.lane.b32.xlu1 %v613_v18, %s1222_s14 }
 0x256   : > { %674 = vrot.lane.b32.xlu0 %v610_v17, %s1224_s16  ;;  %666 = vrot.lane.b32.xlu1 %v613_v18, %s1223_s15 }
 0x25a   : > { %688 = vrot.lane.b32.xlu0 %v610_v17, %s1225_s8  ;;  %680 = vrot.lane.b32.xlu1 %v613_v18, %s1224_s16 }
 0x25e   : > { %702 = vrot.lane.b32.xlu0 %v610_v17, %s1226_s7  ;;  %694 = vrot.lane.b32.xlu1 %v613_v18, %s1225_s8 }
 0x262   : > { %620 = vrot.lane.b32.xlu0 %v596_v14, %s1220_s29  ;;  %708 = vrot.lane.b32.xlu1 %v613_v18, %s1226_s7 }
 0x266   : > { %634 = vrot.lane.b32.xlu0 %v596_v14, %s1221_s12  ;;  %622 = vrot.lane.b32.xlu1 %v597_v16, %s1220_s29  ;;  %s1152_s29 = sshll.u32 %s1229_s17, 4  ;;  %s1153_s29 = int_to_ptr.vmem [resolvable:$false] %s1152_s29 }
 0x26a   : > { %648 = vrot.lane.b32.xlu0 %v596_v14, %s1222_s14  ;;  %636 = vrot.lane.b32.xlu1 %v597_v16, %s1221_s12  ;;  %s1154_s12 = scalar_lea.vmem %s1153_s29, 1536 }
 0x26e   : > { %662 = vrot.lane.b32.xlu0 %v596_v14, %s1223_s15  ;;  %650 = vrot.lane.b32.xlu1 %v597_v16, %s1222_s14 }
 0x272   : > { %676 = vrot.lane.b32.xlu0 %v596_v14, %s1224_s16  ;;  %664 = vrot.lane.b32.xlu1 %v597_v16, %s1223_s15 }
 0x276   : > { %690 = vrot.lane.b32.xlu0 %v596_v14, %s1225_s8  ;;  %678 = vrot.lane.b32.xlu1 %v597_v16, %s1224_s16 }
 0x27a   : > { %704 = vrot.lane.b32.xlu0 %v596_v14, %s1226_s7  ;;  %692 = vrot.lane.b32.xlu1 %v597_v16, %s1225_s8 }
 0x27e   : > { %718 = vrot.lane.b32.xlu0 %v596_v14, %s1227_s11  ;;  %706 = vrot.lane.b32.xlu1 %v597_v16, %s1226_s7  ;;  %s1017_s7 = smul.u32 48, %s1366_s23 }
 0x282   : > { %716 = vrot.lane.b32.xlu0 %v610_v17, %s1227_s11  ;;  %720 = vrot.lane.b32.xlu1 %v597_v16, %s1227_s11 }
 0x286   : > { %746 = vperm.xlu0 %1085, %v742_v20   ;;  %722 = vrot.lane.b32.xlu1 %v613_v18, %s1227_s11  ;;  %s242_s11 = scalar_lea.vmem [#allocation6], %s1017_s7 }
 0x287   : > { %s919_s25 = sshll.u32 %s242_s11, 4  ;;  %s1613_s25 = int_to_ptr.vmem [resolvable:$true] %s919_s25 }
 0x288   : > { %s1148_s13 = scalar_lea.vmem %s1613_s25, 768  ;;  %p1155_p8 = scmp.lt.s32.totalorder %s1613_s25, %s1153_s29 }
 0x289   : > { %p1149_p6 = scmp.ne.s32.totalorder %s1613_s25, %s1148_s13  ;;  %p1156_p10 = scmp.lt.s32.totalorder %s1154_s12, %s1148_s13 }
 0x28a   : > { %751 = vperm.xlu1 %1086, %v743_v21   ;;  %1088 = vrot.lane.b32.xlu0 %v1087_v30, %s1223_s15 }
 0x28b   : > { %p1150_p12 = pnand %p1149_p6, %p1690_p11  ;;  %p1157_p0 = por %p1156_p10, %p1155_p8 }
 0x28d   : > { %p1151_p13 = pneg %p1150_p12 }
 0x28e   : > { %1093 = vrot.lane.b32.xlu1 %v1092_v31, %s1223_s15  ;;  %1098 = vrot.lane.b32.xlu0 %v1097_v32, %s1223_s15 }
 0x28f   : > { %p1158_p2 = pnand %p1157_p0, %p1151_p13 }
 0x292   : > { %1103 = vrot.lane.b32.xlu1 %v1102_v1, %s1223_s15 }
 0x2b8   : > { %v619_v3 = vpop.permute.xlu0 %618 }
 0x2bc   : > { %v633_v33 = vpop.permute.xlu0 %632  ;;  %v625_v34 = vpop.permute.xlu1 %624 }
 0x2c0   : > { %v647_v2 = vpop.permute.xlu0 %646  ;;  %v639_v35 = vpop.permute.xlu1 %638 }
 0x2c4   : > { %v661_v36 = vpop.permute.xlu0 %660  ;;  %v653_v37 = vpop.permute.xlu1 %652 }
 0x2c8   : > { %v675_v6 = vpop.permute.xlu0 %674  ;;  %v667_v38 = vpop.permute.xlu1 %666 }
 0x2cc   : > { %v689_v39 = vpop.permute.xlu0 %688  ;;  %v681_v40 = vpop.permute.xlu1 %680 }
 0x2d0   : > { %v1568_v41 = vpop.permute.xlu0 %702  ;;  %v695_v42 = vpop.permute.xlu1 %694 }
 0x2d4   : > { %v621_v43 = vpop.permute.xlu0 %620  ;;  %v709_v44 = vpop.permute.xlu1 %708 }
 0x2d5   : > { %v626_v49 = vsel %vm339_vm1, %v619_v3, %v621_v43 }
 0x2d8   : > { %v635_v45 = vpop.permute.xlu0 %634  ;;  %v623_v46 = vpop.permute.xlu1 %622 }
 0x2d9   : > { %v628_v47 = vsel %vm339_vm1, %v623_v46, %v625_v34  ;;  %v627_v48 = vsel %vm339_vm1, %v621_v43, %v623_v46  ;;  %v640_v54 = vsel %vm354_vm2, %v633_v33, %v635_v45  ;;  %vm1685_vm1 = vmmov %vm1684_vm0 }
 0x2da   : > { %768 = vmatprep.subr.bf16.mxu0 %v627_v48  ;;  %812 = vmatpush1.bf16.msra.mxu1 %v628_v47 }
 0x2db   : > { %769 = vmatpush1.bf16.msra.mxu0 %v626_v49  ;;  %813 = vmatprep.subr.bf16.mxu1 %v1219_v0 }
 0x2dc   : > { %v649_v50 = vpop.permute.xlu0 %648  ;;  %v637_v51 = vpop.permute.xlu1 %636 }
 0x2dd   : > { %v642_v52 = vsel %vm354_vm2, %v637_v51, %v639_v35  ;;  %v641_v53 = vsel %vm354_vm2, %v635_v45, %v637_v51  ;;  %v654_v59 = vsel %vm369_vm3, %v647_v2, %v649_v50  ;;  %vm1686_vm2 = vmmov %vm1684_vm0 }
 0x2de   : > { %770 = vmatprep.subr.bf16.mxu0 %v641_v53  ;;  %814 = vmatpush1.bf16.msra.mxu1 %v642_v52 }
 0x2df   : > { %771 = vmatpush1.bf16.msra.mxu0 %v640_v54  ;;  %815 = vmatprep.subr.bf16.mxu1 %v1219_v0 }
 0x2e0   : > { %v663_v55 = vpop.permute.xlu0 %662  ;;  %v651_v56 = vpop.permute.xlu1 %650 }
 0x2e1   : > { %v656_v57 = vsel %vm369_vm3, %v651_v56, %v653_v37  ;;  %v655_v58 = vsel %vm369_vm3, %v649_v50, %v651_v56  ;;  %v668_v4 = vsel %vm384_vm4, %v661_v36, %v663_v55  ;;  %vm1687_vm3 = vcmask 637952  }
 0x2e2   : > { %772 = vmatprep.subr.bf16.mxu0 %v655_v58  ;;  %816 = vmatpush1.bf16.msra.mxu1 %v656_v57 }
 0x2e3   : > { %773 = vmatpush1.bf16.msra.mxu0 %v654_v59  ;;  %817 = vmatprep.subr.bf16.mxu1 %v1219_v0 }
 0x2e4   : > { %v677_v60 = vpop.permute.xlu0 %676  ;;  %v665_v61 = vpop.permute.xlu1 %664 }
 0x2e5   : > { %v670_v62 = vsel %vm384_vm4, %v665_v61, %v667_v38  ;;  %v669_v63 = vsel %vm384_vm4, %v663_v55, %v665_v61  ;;  %v682_v10 = vsel %vm399_vm5, %v675_v6, %v677_v60 }
 0x2e6   : > { %774 = vmatprep.subr.bf16.mxu0 %v669_v63  ;;  %818 = vmatpush1.bf16.msra.mxu1 %v670_v62 }
 0x2e7   : > { %775 = vmatpush1.bf16.msra.mxu0 %v668_v4  ;;  %819 = vmatprep.subr.bf16.mxu1 %v1219_v0 }
 0x2e8   : > { %v691_v5 = vpop.permute.xlu0 %690  ;;  %v679_v7 = vpop.permute.xlu1 %678 }
 0x2e9   : > { %v684_v8 = vsel %vm399_vm5, %v679_v7, %v681_v40  ;;  %v683_v9 = vsel %vm399_vm5, %v677_v60, %v679_v7  ;;  %v696_v15 = vsel %vm414_vm6, %v689_v39, %v691_v5  ;;  %vm1688_vm5 = vmmov %vm1687_vm3 }
 0x2ea   : > { %776 = vmatprep.subr.bf16.mxu0 %v683_v9  ;;  %820 = vmatpush1.bf16.msra.mxu1 %v684_v8 }
 0x2eb   : > { %777 = vmatpush1.bf16.msra.mxu0 %v682_v10  ;;  %821 = vmatprep.subr.bf16.mxu1 %v1219_v0 }
 0x2ec   : > { %v705_v11 = vpop.permute.xlu0 %704  ;;  %v693_v12 = vpop.permute.xlu1 %692 }
 0x2ed   : > { %v698_v13 = vsel %vm414_vm6, %v693_v12, %v695_v42  ;;  %v697_v14 = vsel %vm414_vm6, %v691_v5, %v693_v12  ;;  %v710_v20 = vsel %vm1686_vm2, %v1568_v41, %v705_v11  ;;  %vm1689_vm6 = vmmov %vm1687_vm3 }
 0x2ee   : > { %778 = vmatprep.subr.bf16.mxu0 %v697_v14  ;;  %822 = vmatpush1.bf16.msra.mxu1 %v698_v13 }
 0x2ef   : > { %779 = vmatpush1.bf16.msra.mxu0 %v696_v15  ;;  %823 = vmatprep.subr.bf16.mxu1 %v1219_v0 }
 0x2f0   : > { %v719_v16 = vpop.permute.xlu0 %718  ;;  %v707_v17 = vpop.permute.xlu1 %706 }
 0x2f1   : > { %v712_v18 = vsel %vm1684_vm0, %v707_v17, %v709_v44  ;;  %v711_v19 = vsel %vm1685_vm1, %v705_v11, %v707_v17 }
 0x2f2   : > { %780 = vmatprep.subr.bf16.mxu0 %v711_v19  ;;  %824 = vmatpush1.bf16.msra.mxu1 %v712_v18 }
 0x2f3   : > { %781 = vmatpush1.bf16.msra.mxu0 %v710_v20  ;;  %825 = vmatprep.subr.bf16.mxu1 %v1219_v0 }
 0x2f4   : > { %v717_v21 = vpop.permute.xlu0 %716  ;;  %v721_v22 = vpop.permute.xlu1 %720 }
 0x2f5   : > { %v724_v23 = vsel %vm1687_vm3, %v717_v21, %v719_v16  ;;  %v725_v24 = vsel %vm1688_vm5, %v719_v16, %v721_v22 }
 0x2f6   : > { %782 = vmatprep.subr.bf16.mxu0 %v725_v24 }
 0x2f7   : > { %783 = vmatpush1.bf16.msra.mxu0 %v724_v23 }
 0x2f8   : > { %v723_v26 = vpop.permute.xlu1 %722 }
 0x2f9   : > { %v726_v27 = vsel %vm1689_vm6, %v721_v22, %v723_v26 }
 0x2fa   : > { %799 = vmatmul.mubr.bf16.vlgmr.msra.gmra.mrb[4].mxu0 %v1117_v25  ;;  %826 = vmatpush1.bf16.msra.mxu1 %v726_v27 }
 0x2fd   : > { %842 = vmatmul.mubr.bf16.vlgmr.msra.gmra.mrb[4].mxu1 %v1117_v25 }
 0x305   : > { %v747_v0 = vpop.permute.xlu0 %746 }
 0x309   : > { %v752_v28 = vpop.permute.xlu1 %751  ;;  %v1089_v29 = vpop.permute.xlu0 %1088 }
 0x30a   : > { %v1091_v32 = vunpack.i.h.bf16 %v1089_v29  ;;  %v1090_v1 = vunpack.i.l.bf16 %v1089_v29 }
 0x30c   : > { %v875_v37 = vsel %vm384_vm4, %v1090_v1, %v1091_v32 }
 0x30d   : > { %v1094_v30 = vpop.permute.xlu1 %1093  ;;  %v1099_v31 = vpop.permute.xlu0 %1098 }
 0x30e   : > { %v1095_v33 = vunpack.i.l.bf16 %v1094_v30  ;;  %v1101_v34 = vunpack.i.h.bf16 %v1099_v31  ;;  %v1100_v2 = vunpack.i.l.bf16 %v1099_v31  ;;  %v1096_v6 = vunpack.i.h.bf16 %v1094_v30 }
 0x310   : > { %v876_v40 = vsel %vm384_vm4, %v1091_v32, %v1095_v33  ;;  %v878_v44 = vsel %vm384_vm4, %v1100_v2, %v1101_v34  ;;  %v877_v56 = vsel %vm384_vm4, %v1095_v33, %v1096_v6 }
 0x311   : > { %v1104_v3 = vpop.permute.xlu1 %1103 }
 0x312   : > { %v1105_v35 = vunpack.i.l.bf16 %v1104_v3  ;;  %v1106_v41 = vunpack.i.h.bf16 %v1104_v3 }
 0x314   : > { %v879_v48 = vsel %vm384_vm4, %v1101_v34, %v1105_v35  ;;  %v880_v58 = vsel %vm384_vm4, %v1105_v35, %v1106_v41 }
 0x3cd   : > { %v800_v36 = vpop.f32.mrb[4].mxu0 }
 0x3ce   : > { %v801_v38 = vadd.f32 %v800_v36, %v747_v0  ;;  %v802_v39 = vpop.f32.mrb[5].mxu0 }
 0x3cf   : > { %v803_v42 = vadd.f32 %v802_v39, %v747_v0  ;;  %v804_v43 = vpop.f32.mrb[6].mxu0 }
 0x3d0   : > { %v887_v45 = vadd.f32 %v875_v37, %v801_v38  ;;  %v805_v46 = vadd.f32 %v804_v43, %v752_v28  ;;  %v806_v47 = vpop.f32.mrb[7].mxu0  ;;  %v843_v49 = vpop.f32.mrb[4].mxu1 }
 0x3d1   : > { %v888_v50 = vadd.f32 %v876_v40, %v803_v42  ;;  %v807_v51 = vadd.f32 %v806_v47, %v752_v28  ;;  %v844_v52 = vadd.f32 %v843_v49, %v747_v0  ;;  %v845_v53 = vpop.f32.mrb[5].mxu1 }
 0x3d2   : > { %v893_v54 = vmax.f32 %v887_v45, 0.0  ;;  %v890_v55 = vadd.f32 %v878_v44, %v805_v46  ;;  %v846_v57 = vpop.f32.mrb[6].mxu1 }
 0x3d3   : > { %v894_v59 = vmax.f32 %v888_v50, 0.0  ;;  %v891_v60 = vadd.f32 %v879_v48, %v807_v51  ;;  %v889_v61 = vadd.f32 %v877_v56, %v844_v52  ;;  %v847_v62 = vadd.f32 %v846_v57, %v752_v28  ;;  %v848_v63 = vpop.f32.mrb[7].mxu1 }
 0x3d4   : > { %899 = vst [vmem:[%s242_s11] sm:$0xff] %v893_v54  ;;  %v896_v4 = vmax.f32 %v890_v55, 0.0 }
 0x3d5   : > { %900 = vst [vmem:[%s242_s11 + $0x8] sm:$0xff] %v894_v59  ;;  %v897_v5 = vmax.f32 %v891_v60, 0.0  ;;  %v895_v7 = vmax.f32 %v889_v61, 0.0  ;;  %v892_v8 = vadd.f32 %v880_v58, %v847_v62 }
 0x3d6   : > { %902 = vst [vmem:[%s242_s11 + $0x18] sm:$0xff] %v896_v4 }
 0x3d7   : > { %903 = vst [vmem:[%s242_s11 + $0x20] sm:$0xff] %v897_v5  ;;  %901 = vst [vmem:[%s242_s11 + $0x10] sm:$0xff] %v895_v7  ;;  %v898_v9 = vmax.f32 %v892_v8, 0.0 }
 0x3d9   : > { %904 = vst [vmem:[%s242_s11 + $0x28] sm:$0xff] %v898_v9 }
 0x3da   : > { %1161 = shalt.err (!%p1158_p2)
}
 0x3db   : > { %s1162_s14 = scalar_lea.hbm %s1618_s9, 768  ;;  %s1166_s8 = scalar_lea.hbm %s1667_s5, 1536 }
 0x3dc   : > { %p1163_p4 = scmp.ne.s32.totalorder %s1618_s9, %s1162_s14  ;;  %p1167_p9 = scmp.lt.u32.totalorder %s1618_s9, %s1667_s5 }
 0x3dd   : > { %p1168_p1 = scmp.lt.u32.totalorder %s1166_s8, %s1162_s14  ;;  %p1170_p6 = scmp.lt.u32.totalorder %s1162_s14, %s1618_s9 }
 0x3de   : > { %p1164_p5 = pnand %p1163_p4, %p1690_p11 }
 0x3df   : > { %p1169_p3 = por %p1168_p1, %p1167_p9 }
 0x3e0   : > { %p1165_p7 = pneg %p1164_p5 }
 0x3e1   : > { %p1171_p12 = por %p1170_p6, %p1169_p3 }
 0x3e3   : > { %p1172_p13 = pnand %p1171_p12, %p1165_p7 }
 0x3e5   : > { %1175 = shalt.err (!%p1172_p13)
}
 0x3e6   : > { %s1230_s26 = smov 384   ;;  %s1231_s22 = smov 24  }
 0x3e7   : > { %1027 = dma.vmem_to_hbm [thread:$0]  (%p1690_p11), %s1613_s25, 768, %s1618_s9, %s906_s10, %s1230_s26, %s1230_s26, %s1231_s22  }
 0x3e8 PF: > { %s934_s28 = sand.u32 1, %s1202_s18   ;;  %p1691_p8 = scmp.ne.s32.totalorder %s1674_s6, 0 }
 0x3e9   : > { %p1692_p10 = scmp.ge.s32.totalorder %s1214_s21, 2  ;;  %s935_s13 = scalar_lea.sflag [#allocation5], %s934_s28 }
 0x3eb   : > { %p1034_p0 = pnand %p1692_p10, %p1691_p8 }
 0x3ed   : > { %1197 = dma.done.wait (!%p1034_p0), %s935_s13, 768  }
 0x3ee   : > { %1199 = vsyncadd (!%p1034_p0), %s935_s13, 4294966528  ;;  %p18_p2 = scmp.ge.s32.totalorder %s1287_s24, 4   ;;  %s1693_s18 = smov %s1206_s19 }
 0x3ef   : > { %s1694_s19 = smov %s1210_s20  ;;  %s1695_s20 = smov %s1299_s27 }
 0x3f0   : > { %s1696_s21 = smov %s1287_s24  ;;  %20 = sbr.rel (!%p18_p2) target bundleno = 5 (0x5), region = 85 }
 0x3f7   :  { %940 = vsyncpa [#allocation4], 1 }
 0x3f8   :  { %942 = vsyncpa [#allocation4 + $0x1], 1 }
 0x3f9   :  { %943 = vsyncpa [#allocation5], 1 }
 0x3fa   :  { %945 = vsyncpa [#allocation5 + $0x1], 1 }

</bundles_post_ra>
